<compile_context>
chip_gen: v6e
topology: v6e:2x2x1
jax: 0.10.0
libtpu: 0.0.40
codegen_flags: <defaults>
</compile_context>

<pallas_src>
import functools
import math

import jax
import jax.numpy as jnp
from jax.experimental import pallas as pl
from jax.experimental.pallas import tpu as pltpu


def _round_up(x, m):
    return (x + m - 1) // m * m


def _sdpa_kernel(inv_scale, q_ref, k_ref, v_ref, o_ref):
    # Refs: q/o are (1, tq, Dp); k/v are (1, S, Dp) (whole key axis resident).
    q = q_ref[...]
    k = k_ref[...]
    v = v_ref[...]

    # QK^T: contract over the feature axis.  The contracting dim is the last
    # dim of both operands (no explicit transpose of K in the kernel body).
    s = jnp.einsum("bqd,bkd->bqk", q, k, preferred_element_type=jnp.float32)

    # Fold 1/scale into the (tq, Sk) scores instead of the (tq, D) Q slab.
    s = s * inv_scale

    # Numerically stable softmax over the key axis, f32 throughout.
    m = jnp.max(s, axis=-1, keepdims=True)
    e = jnp.exp(s - m)
    # approx=True lowers to the EUP reciprocal (separate issue slot); ~1e-4
    # relative error on the normalization, covered by the test tolerance.
    p = e * pl.reciprocal(jnp.sum(e, axis=-1, keepdims=True), approx=True)

    # dropout(p, 0.0) == identity.

    # output = p @ v (f32 accumulate on the MXU).
    o_ref[...] = jnp.einsum(
        "bqk,bkd->bqd", p, v, preferred_element_type=jnp.float32
    ).astype(o_ref.dtype)


# Conservative per-step VMEM budget: below v5e's 16 MiB default scoped limit
# and well below v7x's 32 MiB scoped / 64 MiB physical VMEM.
_VMEM_BUDGET_BYTES = 12 * 1024 * 1024


def _per_step_vmem_bytes(tq, s, dp, itemsize):
    kv = 2 * 2 * s * dp * itemsize      # K and V tiles, double-buffered
    qo = 2 * 2 * tq * dp * itemsize     # Q and O tiles, double-buffered
    scores = 3 * tq * s * 4             # scores / exp / probs intermediates (f32)
    return kv + qo + scores


def _pick_q_tile(s, dp, itemsize):
    if _per_step_vmem_bytes(s, s, dp, itemsize) <= _VMEM_BUDGET_BYTES:
        return s                        # single query tile (reference shape)
    tq = max(8, _round_up(s, 8) // 2 // 8 * 8)
    while tq > 8 and _per_step_vmem_bytes(tq, s, dp, itemsize) > _VMEM_BUDGET_BYTES:
        tq = max(8, tq // 2 // 8 * 8)
    return tq


def sdpa(x1, x2, x3):
    """out = softmax((x1 @ x2^T) / sqrt(D), -1) @ x3   (dropout p = 0.0)."""
    B, S, D = x1.shape
    assert x2.shape == (B, S, D) and x3.shape == (B, S, D)
    inv_scale = 1.0 / math.sqrt(D)      # __scale_factor__ = sqrt(D)

    # Lane padding only when D is not a multiple of 128.  No S padding: whole-S
    # block dims equal the full array dims, so no key mask is needed and the
    # padded feature columns contribute exactly zero to QK^T / add zero output
    # columns (sliced off below).
    Dp = max(_round_up(D, 128), 128)
    if Dp != D:
        pad = lambda x: jnp.pad(x, ((0, 0), (0, 0), (0, Dp - D)))
        q, k, v = pad(x1), pad(x2), pad(x3)
    else:
        q, k, v = x1, x2, x3

    itemsize = jnp.dtype(q.dtype).itemsize
    tq = _pick_q_tile(S, Dp, itemsize)
    n_q = pl.cdiv(S, tq)

    kernel = functools.partial(_sdpa_kernel, inv_scale)

    cost = pl.CostEstimate(
        flops=4 * B * S * S * Dp,               # QK^T + PV matmuls
        transcendentals=B * S * S,              # exp
        bytes_accessed=4 * B * S * Dp * itemsize,
    )

    out = pl.pallas_call(
        kernel,
        out_shape=jax.ShapeDtypeStruct((B, S, Dp), x1.dtype),
        grid=(B, n_q),
        in_specs=[
            pl.BlockSpec((1, tq, Dp), lambda b, i: (b, i, 0)),
            pl.BlockSpec((1, S, Dp), lambda b, i: (b, 0, 0)),
            pl.BlockSpec((1, S, Dp), lambda b, i: (b, 0, 0)),
        ],
        out_specs=pl.BlockSpec((1, tq, Dp), lambda b, i: (b, i, 0)),
        compiler_params=pltpu.CompilerParams(
            # batch and query tiles are independent -> megacore-shardable (v7x)
            dimension_semantics=("parallel", "parallel"),
            vmem_limit_bytes=32 * 1024 * 1024,
        ),
        cost_estimate=cost,
    )(q, k, v)

    if Dp != D:
        out = out[:, :, :D]
    return out


def sdpa_ref(x1, x2, x3):
    scale = math.sqrt(x1.shape[-1])
    s = jnp.einsum("bqd,bkd->bqk", x1, x2, precision="highest") / scale
    p = jax.nn.softmax(s, axis=-1)
    return jnp.einsum("bqk,bkd->bqd", p, x3, precision="highest")


if __name__ == "__main__":
    key = jax.random.PRNGKey(0)
    k1, k2, k3 = jax.random.split(key, 3)

    # The module's spec shape (1, 25, 768): D is already a lane multiple, so the
    # wrapper does no padding / slicing at all for this case.
    x1 = jax.random.normal(k1, (1, 25, 768), dtype=jnp.float32)
    x2 = jax.random.normal(k2, (1, 25, 768), dtype=jnp.float32)
    x3 = jax.random.normal(k3, (1, 25, 768), dtype=jnp.float32)
    out = sdpa(x1, x2, x3)
    jax.block_until_ready(out)
    assert out.shape == (1, 25, 768)
    # Tolerance covers the EUP approximate reciprocal (~1e-4 rel) plus MXU
    # multi-pass f32 matmul rounding on the D=768 contraction.
    assert jnp.allclose(out, sdpa_ref(x1, x2, x3), atol=2e-3, rtol=2e-3)

    # Small shape exercising the D % 128 != 0 padding path and B > 1 grid.
    y1 = jax.random.normal(k1, (2, 8, 32), dtype=jnp.float32)
    y2 = jax.random.normal(k2, (2, 8, 32), dtype=jnp.float32)
    y3 = jax.random.normal(k3, (2, 8, 32), dtype=jnp.float32)
    out2 = sdpa(y1, y2, y3)
    jax.block_until_ready(out2)
    assert out2.shape == (2, 8, 32)
    assert jnp.allclose(out2, sdpa_ref(y1, y2, y3), atol=2e-3, rtol=2e-3)

    print("KERNEL_OK")
</pallas_src>

<mosaic_0001>
module attributes {stable_mosaic.version = 11 : i64} {
  func.func @_sdpa_kernel(%arg0: i32, %arg1: i32, %arg2: memref<1x25x768xf32, #tpu.memory_space<vmem>>, %arg3: memref<1x25x768xf32, #tpu.memory_space<vmem>>, %arg4: memref<1x25x768xf32, #tpu.memory_space<vmem>>, %arg5: memref<1x25x768xf32, #tpu.memory_space<vmem>>) attributes {dimension_semantics = [#tpu.dimension_semantics<parallel>, #tpu.dimension_semantics<parallel>], iteration_bounds = array<i64: 1, 1>, scalar_prefetch = 0 : i64, scratch_operands = 0 : i64, tpu.core_type = #tpu.core_type<tc>, window_params = [{transform_indices = @transform_0, window_bounds = array<i64: 1, 25, 768>}, {transform_indices = @transform_1, window_bounds = array<i64: 1, 25, 768>}, {transform_indices = @transform_2, window_bounds = array<i64: 1, 25, 768>}, {transform_indices = @transform_3, window_bounds = array<i64: 1, 25, 768>}]} {
    %c0 = arith.constant 0 : index
    %c0_0 = arith.constant 0 : index
    %c0_1 = arith.constant 0 : index
    %0 = vector.load %arg2[%c0, %c0_0, %c0_1] : memref<1x25x768xf32, #tpu.memory_space<vmem>>, vector<1x25x768xf32>
    %c0_2 = arith.constant 0 : index
    %c0_3 = arith.constant 0 : index
    %c0_4 = arith.constant 0 : index
    %1 = vector.load %arg3[%c0_2, %c0_3, %c0_4] : memref<1x25x768xf32, #tpu.memory_space<vmem>>, vector<1x25x768xf32>
    %c0_5 = arith.constant 0 : index
    %c0_6 = arith.constant 0 : index
    %c0_7 = arith.constant 0 : index
    %2 = vector.load %arg4[%c0_5, %c0_6, %c0_7] : memref<1x25x768xf32, #tpu.memory_space<vmem>>, vector<1x25x768xf32>
    "tpu.trace_start"() <{level = 10 : i32, message = "bqd,bkd->bqk"}> : () -> ()
    %cst = arith.constant dense<0.000000e+00> : vector<1x25x25xf32>
    %3 = tpu.matmul %0, %1, %cst {dimension_numbers = #tpu.dot_dimension_numbers<[2], [2], [1], [1], [0, 0, 0, 1, 1, 1], [0], [0]>} : vector<1x25x768xf32>, vector<1x25x768xf32>, vector<1x25x25xf32> -> vector<1x25x25xf32>
    "tpu.trace_stop"() : () -> ()
    %cst_8 = arith.constant 0.0360843912 : f32
    %4 = vector.broadcast %cst_8 : f32 to vector<1x25x25xf32>
    %5 = arith.mulf %3, %4 : vector<1x25x25xf32>
    %cst_9 = arith.constant dense<0xFF800000> : vector<1x25xf32>
    %6 = vector.multi_reduction <maximumf>, %5, %cst_9 [2] : vector<1x25x25xf32> to vector<1x25xf32>
    %7 = vector.shape_cast %6 : vector<1x25xf32> to vector<1x25x1xf32>
    %8 = vector.broadcast %7 : vector<1x25x1xf32> to vector<1x25x25xf32>
    %9 = arith.subf %5, %8 : vector<1x25x25xf32>
    %10 = math.exp %9 : vector<1x25x25xf32>
    %cst_10 = arith.constant dense<0.000000e+00> : vector<1x25xf32>
    %11 = vector.multi_reduction <add>, %10, %cst_10 [2] : vector<1x25x25xf32> to vector<1x25xf32>
    %12 = vector.shape_cast %11 : vector<1x25xf32> to vector<1x25x1xf32>
    %13 = tpu.reciprocal %12 {approx = true} : vector<1x25x1xf32> -> vector<1x25x1xf32>
    %14 = vector.broadcast %13 : vector<1x25x1xf32> to vector<1x25x25xf32>
    %15 = arith.mulf %10, %14 : vector<1x25x25xf32>
    "tpu.trace_start"() <{level = 10 : i32, message = "bqk,bkd->bqd"}> : () -> ()
    %cst_11 = arith.constant dense<0.000000e+00> : vector<1x25x768xf32>
    %16 = tpu.matmul %15, %2, %cst_11 {dimension_numbers = #tpu.dot_dimension_numbers<[2], [1], [1], [2], [0, 0, 0, 1, 1, 2], [0], [0]>} : vector<1x25x25xf32>, vector<1x25x768xf32>, vector<1x25x768xf32> -> vector<1x25x768xf32>
    "tpu.trace_stop"() : () -> ()
    %c0_12 = arith.constant 0 : index
    %c0_13 = arith.constant 0 : index
    %c0_14 = arith.constant 0 : index
    %17 = vector.load %arg5[%c0_12, %c0_13, %c0_14] : memref<1x25x768xf32, #tpu.memory_space<vmem>>, vector<1x25x768xf32>
    tpu.vector_store %arg5[%c0_12, %c0_13, %c0_14], %16 {strides = array<i32>} : memref<1x25x768xf32, #tpu.memory_space<vmem>>, vector<1x25x768xf32>,
    return
  }
  func.func @transform_0(%arg0: i32, %arg1: i32) -> (i32, i32, i32) {
    %c0_i32 = arith.constant 0 : i32
    %c0_i32_0 = arith.constant 0 : i32
    return %arg0, %arg1, %c0_i32 : i32, i32, i32
  }
  func.func @transform_1(%arg0: i32, %arg1: i32) -> (i32, i32, i32) {
    %c0_i32 = arith.constant 0 : i32
    %c0_i32_0 = arith.constant 0 : i32
    %c0_i32_1 = arith.constant 0 : i32
    return %arg0, %c0_i32, %c0_i32_0 : i32, i32, i32
  }
  func.func @transform_2(%arg0: i32, %arg1: i32) -> (i32, i32, i32) {
    %c0_i32 = arith.constant 0 : i32
    %c0_i32_0 = arith.constant 0 : i32
    %c0_i32_1 = arith.constant 0 : i32
    return %arg0, %c0_i32, %c0_i32_0 : i32, i32, i32
  }
  func.func @transform_3(%arg0: i32, %arg1: i32) -> (i32, i32, i32) {
    %c0_i32 = arith.constant 0 : i32
    %c0_i32_0 = arith.constant 0 : i32
    return %arg0, %arg1, %c0_i32 : i32, i32, i32
  }
}

</mosaic_0001>

<bundles_post_ra>
// kernel: tpu_custom_call.1
= control target key start
LH: loop header
LB: loop body
LE: loop exit
PB: predicated region body
PF: predicated region fallthrough
CT: control target
= control target key end

     0   :  { %vm345_vm0 = vcmask 203776   ;;  %vm355_vm1 = vcmask 196608   ;;  %vm403_vm2 = vcmask 1040384   ;;  %s1099_s1 = inlined_call_operand.vmem [shape: f32[1,25,768], index: 1, kind: input, shape index: {}]   ;;  %s1100_s0 = inlined_call_operand.vmem [shape: f32[1,25,768], index: 0, kind: input, shape index: {}]   ;;  %s1101_s2 = inlined_call_operand.vmem [shape: f32[1,25,768], index: 2, kind: input, shape index: {}]   ;;  %s1102_s3 = inlined_call_operand.vmem [shape: f32[1,25,768], index: 3, kind: output, shape index: {}]  }
   0x1   :  { %v57_v0 = vld [vmem:[%s1099_s1 + $0x98] sm:$0x1]  ;;  %v56_v1 = vld [vmem:[%s1099_s1 + $0x90] sm:$0x1]  ;;  %v59_v2 = vld [vmem:[%s1099_s1 + $0xa8] sm:$0x1] }
   0x2   :  { %110 = vmatprep.subr.mxu0 %v57_v0  ;;  %195 = vmatprep.subr.mxu1 %v59_v2  ;;  %v58_v3 = vld [vmem:[%s1099_s1 + $0xa0] sm:$0x1]  ;;  %v51_v4 = vld [vmem:[%s1099_s1 + $0x68] sm:$0xff]  ;;  %v53_v5 = vld [vmem:[%s1099_s1 + $0x78] sm:$0xff] }
   0x3   :  { %111 = vmatpush1.xpose.msra.mxu0 %v56_v1  ;;  %196 = vmatpush1.xpose.msra.mxu1 %v58_v3  ;;  %v50_v6 = vld [vmem:[%s1099_s1 + $0x60] sm:$0xff]  ;;  %v52_v7 = vld [vmem:[%s1099_s1 + $0x70] sm:$0xff]  ;;  %v45_v8 = vld [vmem:[%s1099_s1 + $0x38] sm:$0xff] }
   0x4   :  { %112 = vmatprep.subr.mxu0 %v51_v4  ;;  %197 = vmatprep.subr.mxu1 %v53_v5  ;;  %v47_v9 = vld [vmem:[%s1099_s1 + $0x48] sm:$0xff]  ;;  %v17_v11 = vld [vmem:[%s1100_s0 + $0x18] sm:$0xff]  ;;  %v44_v12 = vld [vmem:[%s1099_s1 + $0x30] sm:$0xff] }
   0x5   :  { %v15_v10 = vld [vmem:[%s1100_s0 + $0x8] sm:$0xff]  ;;  %v46_v13 = vld [vmem:[%s1099_s1 + $0x40] sm:$0xff]  ;;  %v41_v15 = vld [vmem:[%s1099_s1 + $0x18] sm:$0xff]  ;;  %235 = vmatprep.mubr.f32.mxu1 %v17_v11 }
   0x6   :  { %v39_v14 = vld [vmem:[%s1099_s1 + $0x8] sm:$0xff]  ;;  %150 = vmatprep.mubr.f32.mxu0 %v15_v10  ;;  %v38_v16 = vld [vmem:[%s1099_s1] sm:$0xff]  ;;  %v40_v17 = vld [vmem:[%s1099_s1 + $0x10] sm:$0xff] }
   0x7   :  { %113 = vmatpush1.xpose.msra.mxu0 %v50_v6  ;;  %198 = vmatpush1.xpose.msra.mxu1 %v52_v7  ;;  %v61_v18 = vld [vmem:[%s1099_s1 + $0xb8] sm:$0x1]  ;;  %v14_v19 = vld [vmem:[%s1100_s0] sm:$0xff]  ;;  %v16_v20 = vld [vmem:[%s1100_s0 + $0x10] sm:$0xff] }
   0x8   :  { %114 = vmatprep.subr.mxu0 %v45_v8  ;;  %199 = vmatprep.subr.mxu1 %v47_v9  ;;  %v60_v21 = vld [vmem:[%s1099_s1 + $0xb0] sm:$0x1]  ;;  %v21_v22 = vld [vmem:[%s1100_s0 + $0x38] sm:$0xff]  ;;  %v23_v23 = vld [vmem:[%s1100_s0 + $0x48] sm:$0xff] }
   0x9   :  { %v55_v24 = vld [vmem:[%s1099_s1 + $0x88] sm:$0xff]  ;;  %v20_v25 = vld [vmem:[%s1100_s0 + $0x30] sm:$0xff]  ;;  %v22_v26 = vld [vmem:[%s1100_s0 + $0x40] sm:$0xff] }
   0xa   :  { %v54_v27 = vld [vmem:[%s1099_s1 + $0x80] sm:$0xff]  ;;  %v27_v28 = vld [vmem:[%s1100_s0 + $0x68] sm:$0xff]  ;;  %v29_v29 = vld [vmem:[%s1100_s0 + $0x78] sm:$0xff] }
   0xb   :  { %115 = vmatpush1.xpose.msra.mxu0 %v44_v12  ;;  %200 = vmatpush1.xpose.msra.mxu1 %v46_v13  ;;  %v49_v30 = vld [vmem:[%s1099_s1 + $0x58] sm:$0xff]  ;;  %v26_v31 = vld [vmem:[%s1100_s0 + $0x60] sm:$0xff]  ;;  %v28_v32 = vld [vmem:[%s1100_s0 + $0x70] sm:$0xff] }
   0xc   :  { %116 = vmatprep.subr.mxu0 %v39_v14  ;;  %201 = vmatprep.subr.mxu1 %v41_v15  ;;  %v48_v33 = vld [vmem:[%s1099_s1 + $0x50] sm:$0xff]  ;;  %v33_v34 = vld [vmem:[%s1100_s0 + $0x98] sm:$0x1]  ;;  %v35_v35 = vld [vmem:[%s1100_s0 + $0xa8] sm:$0x1] }
   0xd   :  { %v43_v36 = vld [vmem:[%s1099_s1 + $0x28] sm:$0xff]  ;;  %v32_v37 = vld [vmem:[%s1100_s0 + $0x90] sm:$0x1]  ;;  %v34_v38 = vld [vmem:[%s1100_s0 + $0xa0] sm:$0x1] }
   0xe   :  { %v42_v39 = vld [vmem:[%s1099_s1 + $0x20] sm:$0xff]  ;;  %v19_v40 = vld [vmem:[%s1100_s0 + $0x28] sm:$0xff]  ;;  %v25_v42 = vld [vmem:[%s1100_s0 + $0x58] sm:$0xff] }
   0xf   :  { %117 = vmatpush1.xpose.msra.mxu0 %v38_v16  ;;  %202 = vmatpush1.xpose.msra.mxu1 %v40_v17  ;;  %v18_v41 = vld [vmem:[%s1100_s0 + $0x20] sm:$0xff]  ;;  %v24_v43 = vld [vmem:[%s1100_s0 + $0x50] sm:$0xff]  ;;  %v31_v44 = vld [vmem:[%s1100_s0 + $0x88] sm:$0xff] }
  0x10   :  { %280 = vmatprep.subr.mxu0 %v61_v18  ;;  %v30_v45 = vld [vmem:[%s1100_s0 + $0x80] sm:$0xff]  ;;  %v37_v46 = vld [vmem:[%s1100_s0 + $0xb8] sm:$0x1]  ;;  %v36_v47 = vld [vmem:[%s1100_s0 + $0xb0] sm:$0x1] }
  0x12   :  { %151 = vmatmul.mubr.f32.vlgmr.msra.gmra.mxu0 %v14_v19  ;;  %236 = vmatmul.mubr.f32.vlgmr.msra.gmra.mxu1 %v16_v20 }
  0x13   :  { %281 = vmatpush1.xpose.msra.mxu0 %v60_v21  ;;  %155 = vmatprep.mubr.f32.mxu0 %v21_v22 }
  0x14   :  { %240 = vmatprep.mubr.f32.mxu1 %v23_v23  ;;  %282 = vmatprep.subr.mxu0 %v55_v24 }
  0x16   :  { %156 = vmatmul.mubr.f32.gmra.mxu0 %v20_v25  ;;  %241 = vmatmul.mubr.f32.gmra.mxu1 %v22_v26 }
  0x17   :  { %283 = vmatpush1.xpose.msra.mxu0 %v54_v27  ;;  %160 = vmatprep.mubr.f32.mxu0 %v27_v28 }
  0x18   :  { %245 = vmatprep.mubr.f32.mxu1 %v29_v29  ;;  %284 = vmatprep.subr.mxu0 %v49_v30 }
  0x1a   :  { %161 = vmatmul.mubr.f32.gmra.mxu0 %v26_v31  ;;  %246 = vmatmul.mubr.f32.gmra.mxu1 %v28_v32 }
  0x1b   :  { %285 = vmatpush1.xpose.msra.mxu0 %v48_v33  ;;  %165 = vmatprep.mubr.f32.mxu0 %v33_v34 }
  0x1c   :  { %250 = vmatprep.mubr.f32.mxu1 %v35_v35  ;;  %286 = vmatprep.subr.mxu0 %v43_v36 }
  0x1e   :  { %166 = vmatmul.mubr.f32.gmra.mxu0 %v32_v37  ;;  %251 = vmatmul.mubr.f32.gmra.mxu1 %v34_v38 }
  0x1f   :  { %287 = vmatpush1.xpose.msra.mxu0 %v42_v39  ;;  %320 = vmatprep.mubr.f32.mxu0 %v19_v40 }
  0x22   :  { %321 = vmatmul.mubr.f32.vlgmr.msra.gmra.mxu0 %v18_v41 }
  0x23   :  { %325 = vmatprep.mubr.f32.mxu0 %v25_v42 }
  0x26   :  { %326 = vmatmul.mubr.f32.gmra.mxu0 %v24_v43 }
  0x27   :  { %330 = vmatprep.mubr.f32.mxu0 %v31_v44  ;;  %v81_v44 = vld [vmem:[%s1101_s2 + $0x98] sm:$0x1] }
  0x28   :  { %717 = vmatprep.subr.msk.mxu1 %vm403_vm2, %v81_v44 }
  0x2a   :  { %331 = vmatmul.mubr.f32.gmra.mxu0 %v30_v45  ;;  %v83_v45 = vld [vmem:[%s1101_s2 + $0xa8] sm:$0x1] }
  0x2b   :  { %335 = vmatprep.mubr.f32.mxu0 %v37_v46  ;;  %v80_v46 = vld [vmem:[%s1101_s2 + $0x90] sm:$0x1]  ;;  %723 = vmatprep.subr.msk.mxu0 %vm403_vm2, %v83_v45 }
  0x2c   :  { %718 = vmatpush1.msk.msra.mxu1 %vm403_vm2, %v80_v46 }
  0x2e   :  { %336 = vmatmul.mubr.f32.gmra.mxu0 %v36_v47  ;;  %v82_v47 = vld [vmem:[%s1101_s2 + $0xa0] sm:$0x1] }
  0x2f   :  { %724 = vmatpush1.msk.msra.mxu0 %vm403_vm2, %v82_v47 }
  0xd2   :  { %v152_v48 = vpop.f32.mrf.mxu0  ;;  %v237_v49 = vpop.f32.mrf.mxu1 }
  0xd3   :  { %v238_v0 = vadd.f32 %v237_v49, %v152_v48  ;;  %v75_v48 = vld [vmem:[%s1101_s2 + $0x68] sm:$0xff]  ;;  %v77_v49 = vld [vmem:[%s1101_s2 + $0x78] sm:$0xff] }
  0xd4   :  { %v154_v50 = vpop.f32.mrf.mxu0  ;;  %v239_v51 = vpop.f32.mrf.mxu1  ;;  %448 = vmatprep.subr.mxu1 %v75_v48  ;;  %537 = vmatprep.subr.mxu0 %v77_v49 }
  0xd5   :  { %v74_v50 = vld [vmem:[%s1101_s2 + $0x60] sm:$0xff]  ;;  %v76_v51 = vld [vmem:[%s1101_s2 + $0x70] sm:$0xff] }
  0xd6   :  { %v157_v52 = vpop.f32.mrf.mxu0  ;;  %v242_v53 = vpop.f32.mrf.mxu1  ;;  %449 = vmatpush1.msra.mxu1 %v74_v50  ;;  %538 = vmatpush1.msra.mxu0 %v76_v51 }
  0xd7   :  { %v243_v4 = vadd.f32 %v242_v53, %v157_v52  ;;  %v69_v52 = vld [vmem:[%s1101_s2 + $0x38] sm:$0xff]  ;;  %v71_v53 = vld [vmem:[%s1101_s2 + $0x48] sm:$0xff] }
  0xd8   :  { %v159_v54 = vpop.f32.mrf.mxu0  ;;  %v244_v55 = vpop.f32.mrf.mxu1  ;;  %450 = vmatprep.subr.mxu1 %v69_v52  ;;  %539 = vmatprep.subr.mxu0 %v71_v53 }
  0xd9   :  { %v68_v54 = vld [vmem:[%s1101_s2 + $0x30] sm:$0xff]  ;;  %v70_v55 = vld [vmem:[%s1101_s2 + $0x40] sm:$0xff] }
  0xda   :  { %v162_v56 = vpop.f32.mrf.mxu0  ;;  %v247_v57 = vpop.f32.mrf.mxu1  ;;  %451 = vmatpush1.msra.mxu1 %v68_v54  ;;  %540 = vmatpush1.msra.mxu0 %v70_v55 }
  0xdb   :  { %v248_v10 = vadd.f32 %v247_v57, %v162_v56  ;;  %v63_v56 = vld [vmem:[%s1101_s2 + $0x8] sm:$0xff]  ;;  %v65_v57 = vld [vmem:[%s1101_s2 + $0x18] sm:$0xff] }
  0xdc   :  { %v164_v58 = vpop.f32.mrf.mxu0  ;;  %v249_v59 = vpop.f32.mrf.mxu1  ;;  %452 = vmatprep.subr.mxu1 %v63_v56  ;;  %541 = vmatprep.subr.mxu0 %v65_v57 }
  0xdd   :  { %v62_v58 = vld [vmem:[%s1101_s2] sm:$0xff]  ;;  %v64_v59 = vld [vmem:[%s1101_s2 + $0x10] sm:$0xff] }
  0xde   :  { %v167_v60 = vpop.f32.mrf.mxu0  ;;  %v252_v61 = vpop.f32.mrf.mxu1  ;;  %453 = vmatpush1.msra.mxu1 %v62_v58  ;;  %542 = vmatpush1.msra.mxu0 %v64_v59 }
  0xdf   :  { %v253_v16 = vadd.f32 %v252_v61, %v167_v60  ;;  %v752_v60 = vmov 0.0   ;;  %v85_v61 = vld [vmem:[%s1101_s2 + $0xb8] sm:$0x1] }
  0xe0   :  { %v169_v62 = vpop.f32.mrf.mxu0  ;;  %v254_v63 = vpop.f32.mrf.mxu1  ;;  %486 = vmatprep.mubr.f32.mxu1 %v752_v60  ;;  %575 = vmatprep.mubr.f32.mxu0 %v752_v60 }
  0xe1   :  { %729 = vmatprep.subr.msk.mxu1 %vm403_vm2, %v85_v61 }
  0xe2   :  { %v322_v1 = vpop.f32.mrf.mxu0 }
  0xe3   :  { %v323_v2 = vadd.f32 %v322_v1, %v238_v0 }
  0xe4   :  { %v324_v3 = vpop.f32.mrf.mxu0 }
  0xe5   :  { %v341_v5 = vmul.f32 0.03608439, %v323_v2 }
  0xe6   :  { %v327_v6 = vpop.f32.mrf.mxu0 }
  0xe7   :  { %v328_v7 = vadd.f32 %v327_v6, %v243_v4  ;;  %v346_v8 = vsel %vm345_vm0, %v341_v5, -inf  ;;  %v84_v4 = vld [vmem:[%s1101_s2 + $0xb0] sm:$0x1]  ;;  %v78_v6 = vld [vmem:[%s1101_s2 + $0x80] sm:$0xff] }
  0xe8   :  { %v329_v9 = vpop.f32.mrf.mxu0  ;;  %347 = vmax.xlane.f32.xlu0 %v346_v8 }
  0xe9   :  { %v342_v11 = vmul.f32 0.03608439, %v328_v7  ;;  %v73_v9 = vld [vmem:[%s1101_s2 + $0x58] sm:$0xff] }
  0xea   :  { %v332_v12 = vpop.f32.mrf.mxu0 }
  0xeb   :  { %v333_v13 = vadd.f32 %v332_v12, %v248_v10  ;;  %v349_v14 = vsel %vm345_vm0, %v342_v11, -inf  ;;  %v72_v10 = vld [vmem:[%s1101_s2 + $0x50] sm:$0xff] }
  0xec   :  { %v334_v15 = vpop.f32.mrf.mxu0  ;;  %350 = vmax.xlane.f32.xlu0 %v349_v14  ;;  %v66_v14 = vld [vmem:[%s1101_s2 + $0x20] sm:$0xff] }
  0xed   :  { %v343_v17 = vmul.f32 0.03608439, %v333_v13  ;;  %v67_v13 = vld [vmem:[%s1101_s2 + $0x28] sm:$0xff] }
  0xee   :  { %v337_v18 = vpop.f32.mrf.mxu0 }
  0xef   :  { %v338_v19 = vadd.f32 %v337_v18, %v253_v16  ;;  %v352_v20 = vsel %vm345_vm0, %v343_v17, -inf }
  0xf0   :  { %v339_v21 = vpop.f32.mrf.mxu0  ;;  %353 = vmax.xlane.f32.xlu1 %v352_v20 }
  0xf1   :  { %v344_v22 = vmul.f32 0.03608439, %v338_v19 }
  0xf3   :  { %v356_v23 = vsel %vm355_vm1, %v344_v22, -inf }
  0xf4   :  { %357 = vmax.xlane.f32.xlu1 %v356_v23 }
 0x171   :  { %v348_v24 = vpop.xlane.xlu0 %347 }
 0x172   :  { %v359_v25 = vsub.f32 %v341_v5, %v348_v24  ;;  %v79_v5 = vld [vmem:[%s1101_s2 + $0x88] sm:$0xff] }
 0x174   :  { %v363_v26 = vmul.f32 1.442695, %v359_v25 }
 0x175   :  { %v351_v27 = vpop.xlane.xlu0 %350 }
 0x176   :  { %736 = vpow2.f32 %v363_v26  ;;  %v360_v28 = vsub.f32 %v342_v11, %v351_v27 }
 0x178   :  { %v365_v29 = vmul.f32 1.442695, %v360_v28 }
 0x179   :  { %v354_v30 = vpop.xlane.xlu1 %353 }
 0x17a   :  { %738 = vpow2.f32 %v365_v29  ;;  %v361_v31 = vsub.f32 %v343_v17, %v354_v30 }
 0x17c   :  { %v367_v32 = vmul.f32 1.442695, %v361_v31 }
 0x17d   :  { %v358_v33 = vpop.xlane.xlu1 %357 }
 0x17e   :  { %740 = vpow2.f32 %v367_v32  ;;  %v362_v34 = vsub.f32 %v344_v22, %v358_v33 }
 0x180   :  { %v369_v35 = vmul.f32 1.442695, %v362_v34 }
 0x182   :  { %742 = vpow2.f32 %v369_v35 }
 0x183   :  { %v737_v36 = vpop.eup %736 }
 0x184   :  { %v371_v37 = vsel %vm345_vm0, %v737_v36, 0.0 }
 0x185   :  { %372 = vadd.xlane.f32.xlu0 %v371_v37 }
 0x187   :  { %v922_v38 = vpop.eup %738 }
 0x188   :  { %v374_v39 = vsel %vm345_vm0, %v922_v38, 0.0 }
 0x189   :  { %375 = vadd.xlane.f32.xlu1 %v374_v39 }
 0x18b   :  { %v926_v40 = vpop.eup %740 }
 0x18c   :  { %v377_v41 = vsel %vm345_vm0, %v926_v40, 0.0 }
 0x18d   :  { %378 = vadd.xlane.f32.xlu0 %v377_v41 }
 0x18f   :  { %v930_v42 = vpop.eup %742 }
 0x190   :  { %v380_v43 = vsel %vm355_vm1, %v930_v42, 0.0 }
 0x191   :  { %381 = vadd.xlane.f32.xlu1 %v380_v43 }
 0x20e   :  { %v373_v62 = vpop.xlane.xlu0 %372 }
 0x20f   :  { %744 = vrcp.f32 %v373_v62 }
 0x212   :  { %v376_v63 = vpop.xlane.xlu1 %375 }
 0x213   :  { %746 = vrcp.f32 %v376_v63 }
 0x216   :  { %v379_v0 = vpop.xlane.xlu0 %378 }
 0x217   :  { %748 = vrcp.f32 %v379_v0 }
 0x21a   :  { %v382_v1 = vpop.xlane.xlu1 %381 }
 0x21b   :  { %750 = vrcp.f32 %v382_v1 }
 0x21c   :  { %v745_v2 = vpop.eup %744 }
 0x21d   :  { %v387_v3 = vmul.f32 %v745_v2, %v737_v36 }
 0x21f   :  { %719 = vmatmul.mubr.msk.f32.vlgmr.msra.gmra.mxu1 %vm345_vm0, %v387_v3  ;;  %725 = vmatmul.mubr.msk.f32.vlgmr.msra.gmra.mxu0 %vm345_vm0, %v387_v3 }
 0x220   :  { %v747_v7 = vpop.eup %746  ;;  %730 = vmatpush1.msk.msra.mxu1 %vm403_vm2, %v84_v4  ;;  %492 = vmatprep.mubr.f32.mxu1 %v752_v60 }
 0x221   :  { %581 = vmatprep.mubr.f32.mxu0 %v752_v60  ;;  %v388_v8 = vmul.f32 %v747_v7, %v922_v38  ;;  %626 = vmatprep.subr.mxu1 %v79_v5 }
 0x222   :  { %627 = vmatpush1.msra.mxu1 %v78_v6 }
 0x223   :  { %720 = vmatmul.mubr.msk.f32.gmra.mxu1 %vm345_vm0, %v388_v8  ;;  %726 = vmatmul.mubr.msk.f32.gmra.mxu0 %vm345_vm0, %v388_v8 }
 0x224   :  { %v749_v11 = vpop.eup %748  ;;  %498 = vmatprep.mubr.f32.mxu1 %v752_v60  ;;  %587 = vmatprep.mubr.f32.mxu0 %v752_v60 }
 0x225   :  { %v389_v12 = vmul.f32 %v749_v11, %v926_v40  ;;  %628 = vmatprep.subr.mxu1 %v73_v9 }
 0x226   :  { %629 = vmatpush1.msra.mxu1 %v72_v10 }
 0x227   :  { %721 = vmatmul.mubr.msk.f32.gmra.mxu1 %vm345_vm0, %v389_v12  ;;  %727 = vmatmul.mubr.msk.f32.gmra.mxu0 %vm345_vm0, %v389_v12 }
 0x228   :  { %v751_v15 = vpop.eup %750  ;;  %504 = vmatprep.mubr.f32.mxu1 %v752_v60  ;;  %593 = vmatprep.mubr.f32.mxu0 %v752_v60 }
 0x229   :  { %v390_v16 = vmul.f32 %v751_v15, %v930_v42  ;;  %630 = vmatprep.subr.mxu1 %v67_v13 }
 0x22a   :  { %631 = vmatpush1.msra.mxu1 %v66_v14 }
 0x22b   :  { %722 = vmatmul.mubr.msk.f32.gmra.mxu1 %vm345_vm0, %v390_v16  ;;  %728 = vmatmul.mubr.msk.f32.gmra.mxu0 %vm345_vm0, %v390_v16 }
 0x22c   :  { %664 = vmatprep.mubr.f32.mxu1 %v752_v60 }
 0x22f   :  { %731 = vmatmul.mubr.msk.f32.vlgmr.msra.gmra.mxu1 %vm345_vm0, %v387_v3 }
 0x230   :  { %670 = vmatprep.mubr.f32.mxu1 %v752_v60 }
 0x233   :  { %732 = vmatmul.mubr.msk.f32.gmra.mxu1 %vm345_vm0, %v388_v8 }
 0x234   :  { %676 = vmatprep.mubr.f32.mxu1 %v752_v60 }
 0x237   :  { %733 = vmatmul.mubr.msk.f32.gmra.mxu1 %vm345_vm0, %v389_v12 }
 0x238   :  { %682 = vmatprep.mubr.f32.mxu1 %v752_v60 }
 0x23b   :  { %734 = vmatmul.mubr.msk.f32.gmra.mxu1 %vm345_vm0, %v390_v16 }
 0x2df   :  { %v488_v17 = vpop.f32.mrf.mxu1  ;;  %v577_v18 = vpop.f32.mrf.mxu0 }
 0x2e0   :  { %689 = vst [vmem:[%s1102_s3] sm:$0xff] %v488_v17  ;;  %691 = vst [vmem:[%s1102_s3 + $0x10] sm:$0xff] %v577_v18 }
 0x2e1   :  { %v490_v19 = vpop.f32.mrf.mxu1  ;;  %v579_v20 = vpop.f32.mrf.mxu0 }
 0x2e2   :  { %690 = vst [vmem:[%s1102_s3 + $0x8] sm:$0xff] %v490_v19  ;;  %692 = vst [vmem:[%s1102_s3 + $0x18] sm:$0xff] %v579_v20 }
 0x2e3   :  { %v494_v21 = vpop.f32.mrf.mxu1  ;;  %v583_v22 = vpop.f32.mrf.mxu0 }
 0x2e4   :  { %695 = vst [vmem:[%s1102_s3 + $0x30] sm:$0xff] %v494_v21  ;;  %697 = vst [vmem:[%s1102_s3 + $0x40] sm:$0xff] %v583_v22 }
 0x2e5   :  { %v496_v23 = vpop.f32.mrf.mxu1  ;;  %v585_v24 = vpop.f32.mrf.mxu0 }
 0x2e6   :  { %696 = vst [vmem:[%s1102_s3 + $0x38] sm:$0xff] %v496_v23  ;;  %698 = vst [vmem:[%s1102_s3 + $0x48] sm:$0xff] %v585_v24 }
 0x2e7   :  { %v500_v25 = vpop.f32.mrf.mxu1  ;;  %v589_v26 = vpop.f32.mrf.mxu0 }
 0x2e8   :  { %701 = vst [vmem:[%s1102_s3 + $0x60] sm:$0xff] %v500_v25  ;;  %703 = vst [vmem:[%s1102_s3 + $0x70] sm:$0xff] %v589_v26 }
 0x2e9   :  { %v502_v27 = vpop.f32.mrf.mxu1  ;;  %v591_v28 = vpop.f32.mrf.mxu0 }
 0x2ea   :  { %702 = vst [vmem:[%s1102_s3 + $0x68] sm:$0xff] %v502_v27  ;;  %704 = vst [vmem:[%s1102_s3 + $0x78] sm:$0xff] %v591_v28 }
 0x2eb   :  { %v506_v29 = vpop.f32.mrf.mxu1  ;;  %v595_v30 = vpop.f32.mrf.mxu0 }
 0x2ec   :  { %707 = vst [vmem:[%s1102_s3 + $0x90] sm:$0x1] %v506_v29  ;;  %709 = vst [vmem:[%s1102_s3 + $0xa0] sm:$0x1] %v595_v30 }
 0x2ed   :  { %v508_v31 = vpop.f32.mrf.mxu1  ;;  %v597_v32 = vpop.f32.mrf.mxu0 }
 0x2ee   :  { %708 = vst [vmem:[%s1102_s3 + $0x98] sm:$0x1] %v508_v31  ;;  %710 = vst [vmem:[%s1102_s3 + $0xa8] sm:$0x1] %v597_v32 }
 0x2ef   :  { %v666_v33 = vpop.f32.mrf.mxu1 }
 0x2f0   :  { %693 = vst [vmem:[%s1102_s3 + $0x20] sm:$0xff] %v666_v33 }
 0x2f1   :  { %v668_v34 = vpop.f32.mrf.mxu1 }
 0x2f2   :  { %694 = vst [vmem:[%s1102_s3 + $0x28] sm:$0xff] %v668_v34 }
 0x2f3   :  { %v672_v35 = vpop.f32.mrf.mxu1 }
 0x2f4   :  { %699 = vst [vmem:[%s1102_s3 + $0x50] sm:$0xff] %v672_v35 }
 0x2f5   :  { %v674_v36 = vpop.f32.mrf.mxu1 }
 0x2f6   :  { %700 = vst [vmem:[%s1102_s3 + $0x58] sm:$0xff] %v674_v36 }
 0x2f7   :  { %v678_v37 = vpop.f32.mrf.mxu1 }
 0x2f8   :  { %705 = vst [vmem:[%s1102_s3 + $0x80] sm:$0xff] %v678_v37 }
 0x2f9   :  { %v680_v38 = vpop.f32.mrf.mxu1 }
 0x2fa   :  { %706 = vst [vmem:[%s1102_s3 + $0x88] sm:$0xff] %v680_v38 }
 0x2fb   :  { %v684_v39 = vpop.f32.mrf.mxu1 }
 0x2fc   :  { %711 = vst [vmem:[%s1102_s3 + $0xb0] sm:$0x1] %v684_v39 }
 0x2fd   :  { %v686_v40 = vpop.f32.mrf.mxu1 }
 0x2fe   :  { %712 = vst [vmem:[%s1102_s3 + $0xb8] sm:$0x1] %v686_v40 }

</bundles_post_ra>
